<compile_context>
chip_gen: v5e
topology: v5e:2x2
jax: 0.10.0
libtpu: 0.0.40
codegen_flags: <defaults>
</compile_context>

<pallas_src>
import functools

import jax
import jax.numpy as jnp
from jax.experimental import pallas as pl
from jax.experimental.pallas import tpu as pltpu

LANE = 128


def _round_up(x, m):
    return ((x + m - 1) // m) * m


def _elementwise_kernel(x1_ref, x2_ref, add_ref, sub_ref, mul_ref, div_ref, cmp_ref):
    x1 = x1_ref[...]
    x2 = x2_ref[...]
    add_ref[...] = x1 + x2
    sub_ref[...] = x1 - x2
    mul_ref[...] = x1 * x2
    # Matches torch.div(x1, torch.add(x2, 1e-08)); eps kept in the input dtype.
    div_ref[...] = x1 / (x2 + jnp.asarray(1e-08, dtype=x2.dtype))
    # Comparison; stored as bool when supported, else int8 (wrapper converts).
    cmp_ref[...] = (x1 > x2).astype(cmp_ref.dtype)


@functools.lru_cache(maxsize=None)
def _bool_output_supported():
    """One-time probe: can this backend lower a bool-dtype Pallas output?"""
    def probe(x_ref, o_ref):
        o_ref[...] = x_ref[...] > jnp.asarray(0.0, x_ref.dtype)

    try:
        x = jnp.zeros((8, LANE), jnp.float32)
        out = pl.pallas_call(
            probe, out_shape=jax.ShapeDtypeStruct((8, LANE), jnp.bool_)
        )(x)
        jax.block_until_ready(out)
        return True
    except Exception:
        return False


@functools.lru_cache(maxsize=None)
def _tile_config():
    """Returns (max_tile_rows, vmem_limit_bytes or None), sized per TPU generation."""
    mib = 1024 * 1024
    try:
        info = pltpu.get_tpu_info()
        vmem_cap = int(getattr(info, "vmem_capacity_bytes", 0)) or None
    except Exception:
        vmem_cap = None

    if vmem_cap is None:
        # Unknown chip: conservative tile, default scoped-VMEM limit.
        return 1024, None
    if vmem_cap >= 100 * mib:
        # v5e / v6e class (128 MiB physical VMEM): TR=4096 -> ~25 MiB double-buffered.
        return 4096, 48 * mib
    if vmem_cap >= 48 * mib:
        # v7x class (64 MiB per TensorCore): same TR, tighter explicit limit.
        return 4096, 40 * mib
    # Small-VMEM chip (v2/v3 class): modest tile, default limit.
    return 1024, None


def pt_module_forward(x1, x2):
    assert x1.shape == x2.shape and x1.dtype == x2.dtype
    # torch.div is true division; integer inputs would need promotion.
    assert jnp.issubdtype(x1.dtype, jnp.floating), "floating-point inputs expected"

    orig_shape = x1.shape
    n = x1.size

    max_tr, vmem_limit = _tile_config()
    cmp_dtype = jnp.bool_ if _bool_output_supported() else jnp.int8

    # Flatten to a lane-dense 2D slab (rows, 128). Only pad when unavoidable.
    pad = (-n) % LANE
    if pad == 0:
        x1f = x1.reshape(-1, LANE)
        x2f = x2.reshape(-1, LANE)
    else:
        # TODO(synk): the ragged tail could instead be masked in-kernel
        # (scalar-prefetch n + masked store) to avoid these pad/slice HBM passes.
        x1f = jnp.pad(x1.reshape(-1), (0, pad)).reshape(-1, LANE)
        x2f = jnp.pad(x2.reshape(-1), (0, pad)).reshape(-1, LANE)
    rows = x1f.shape[0]

    # Tile the row axis. Small inputs use a single full-array block; otherwise
    # guarantee >= 2 blocks (both v7x TensorCores get work) and keep tr a
    # multiple of 32 so the 8-bit comparison tile stays (32,128)-aligned.
    if rows < 64:
        tr = rows
    else:
        tr = min(max_tr, _round_up(pl.cdiv(rows, 2), 32))
    grid = (pl.cdiv(rows, tr),)

    block = pl.BlockSpec((tr, LANE), lambda i: (i, 0))
    out_shapes = (
        jax.ShapeDtypeStruct((rows, LANE), x1.dtype),   # addition
        jax.ShapeDtypeStruct((rows, LANE), x1.dtype),   # subtraction
        jax.ShapeDtypeStruct((rows, LANE), x1.dtype),   # multiplication
        jax.ShapeDtypeStruct((rows, LANE), x1.dtype),   # division
        jax.ShapeDtypeStruct((rows, LANE), cmp_dtype),  # comparison
    )

    cp_kwargs = dict(dimension_semantics=("parallel",))
    if vmem_limit is not None:
        cp_kwargs["vmem_limit_bytes"] = vmem_limit

    add_o, sub_o, mul_o, div_o, cmp_o = pl.pallas_call(
        _elementwise_kernel,
        out_shape=out_shapes,
        grid=grid,
        in_specs=[block, block],
        out_specs=[block] * 5,
        compiler_params=pltpu.CompilerParams(**cp_kwargs),
    )(x1f, x2f)

    def _unflatten(a, dtype=None):
        if pad:
            a = a.reshape(-1)[:n]
        a = a.reshape(orig_shape)
        if dtype is not None and a.dtype != dtype:
            a = a.astype(dtype)
        return a

    addition = _unflatten(add_o)
    subtraction = _unflatten(sub_o)
    multiplication = _unflatten(mul_o)
    division = _unflatten(div_o)
    comparison = _unflatten(cmp_o, jnp.bool_)
    return addition, subtraction, multiplication, division, comparison


def _check(x1, x2):
    outs = pt_module_forward(x1, x2)
    outs = jax.block_until_ready(outs)
    # Reference mirrors the PyTorch forward (same eps in division).
    ref = (x1 + x2, x1 - x2, x1 * x2,
           x1 / (x2 + jnp.asarray(1e-08, x2.dtype)), x1 > x2)
    for o, r in zip(outs[:4], ref[:4]):
        assert jnp.allclose(o, r, atol=1e-6, rtol=1e-6)
    assert jnp.array_equal(outs[4], ref[4])
    assert outs[4].dtype == jnp.bool_


if __name__ == "__main__":
    key = jax.random.PRNGKey(0)
    k1, k2, k3, k4, k5, k6 = jax.random.split(key, 6)

    # Small NCHW-like shape (numel divisible by 128 -> no pad path, single block).
    x1 = jax.random.normal(k1, (2, 4, 16, 16), dtype=jnp.float32)
    x2 = jax.random.normal(k2, (2, 4, 16, 16), dtype=jnp.float32)
    _check(x1, x2)

    # Odd shape exercising the padded-edge fallback path.
    y1 = jax.random.normal(k3, (3, 5, 7, 11), dtype=jnp.float32)
    y2 = jax.random.normal(k4, (3, 5, 7, 11), dtype=jnp.float32)
    _check(y1, y2)

    # Slightly larger aligned shape exercising the multi-block (parallel grid) path.
    z1 = jax.random.normal(k5, (2, 4, 64, 64), dtype=jnp.float32)
    z2 = jax.random.normal(k6, (2, 4, 64, 64), dtype=jnp.float32)
    _check(z1, z2)

    print("KERNEL_OK")
</pallas_src>

<mosaic_0001>
module attributes {stable_mosaic.version = 11 : i64} {
  func.func @probe(%arg0: memref<8x128xf32, #tpu.memory_space<vmem>>, %arg1: memref<8x128xi32, #tpu.memory_space<vmem>>) attributes {dimension_semantics = [], scalar_prefetch = 0 : i64, scratch_operands = 0 : i64, tpu.core_type = #tpu.core_type<tc>} {
    %c0 = arith.constant 0 : index
    %c0_0 = arith.constant 0 : index
    %0 = vector.load %arg0[%c0, %c0_0] : memref<8x128xf32, #tpu.memory_space<vmem>>, vector<8x128xf32>
    %cst = arith.constant 0.000000e+00 : f32
    %1 = vector.broadcast %cst : f32 to vector<8x128xf32>
    %2 = arith.cmpf ogt, %0, %1 : vector<8x128xf32>
    %c0_1 = arith.constant 0 : index
    %c0_2 = arith.constant 0 : index
    %3 = vector.load %arg1[%c0_1, %c0_2] : memref<8x128xi32, #tpu.memory_space<vmem>>, vector<8x128xi32>
    %4 = arith.extui %2 : vector<8x128xi1> to vector<8x128xi32>
    %cst_3 = arith.constant dense<0> : vector<8x128xi32>
    %5 = arith.cmpi ne, %3, %cst_3 : vector<8x128xi32>
    tpu.vector_store %arg1[%c0_1, %c0_2], %4 {strides = array<i32>} : memref<8x128xi32, #tpu.memory_space<vmem>>, vector<8x128xi32>,
    return
  }
}

module attributes {stable_mosaic.version = 11 : i64} {
  func.func @_elementwise_kernel(%arg0: i32, %arg1: memref<16x128xf32, #tpu.memory_space<vmem>>, %arg2: memref<16x128xf32, #tpu.memory_space<vmem>>, %arg3: memref<16x128xf32, #tpu.memory_space<vmem>>, %arg4: memref<16x128xf32, #tpu.memory_space<vmem>>, %arg5: memref<16x128xf32, #tpu.memory_space<vmem>>, %arg6: memref<16x128xf32, #tpu.memory_space<vmem>>, %arg7: memref<16x128xi8, #tpu.memory_space<vmem>>) attributes {dimension_semantics = [#tpu.dimension_semantics<parallel>], iteration_bounds = array<i64: 1>, scalar_prefetch = 0 : i64, scratch_operands = 0 : i64, tpu.core_type = #tpu.core_type<tc>, window_params = [{transform_indices = @transform_0, window_bounds = array<i64: 16, 128>}, {transform_indices = @transform_1, window_bounds = array<i64: 16, 128>}, {transform_indices = @transform_2, window_bounds = array<i64: 16, 128>}, {transform_indices = @transform_3, window_bounds = array<i64: 16, 128>}, {transform_indices = @transform_4, window_bounds = array<i64: 16, 128>}, {transform_indices = @transform_5, window_bounds = array<i64: 16, 128>}, {transform_indices = @transform_6, window_bounds = array<i64: 16, 128>}]} {
    %c0 = arith.constant 0 : index
    %c0_0 = arith.constant 0 : index
    %0 = vector.load %arg1[%c0, %c0_0] : memref<16x128xf32, #tpu.memory_space<vmem>>, vector<16x128xf32>
    %c0_1 = arith.constant 0 : index
    %c0_2 = arith.constant 0 : index
    %1 = vector.load %arg2[%c0_1, %c0_2] : memref<16x128xf32, #tpu.memory_space<vmem>>, vector<16x128xf32>
    %2 = arith.addf %0, %1 : vector<16x128xf32>
    %c0_3 = arith.constant 0 : index
    %c0_4 = arith.constant 0 : index
    %3 = vector.load %arg3[%c0_3, %c0_4] : memref<16x128xf32, #tpu.memory_space<vmem>>, vector<16x128xf32>
    tpu.vector_store %arg3[%c0_3, %c0_4], %2 {strides = array<i32>} : memref<16x128xf32, #tpu.memory_space<vmem>>, vector<16x128xf32>,
    %4 = arith.subf %0, %1 : vector<16x128xf32>
    %c0_5 = arith.constant 0 : index
    %c0_6 = arith.constant 0 : index
    %5 = vector.load %arg4[%c0_5, %c0_6] : memref<16x128xf32, #tpu.memory_space<vmem>>, vector<16x128xf32>
    tpu.vector_store %arg4[%c0_5, %c0_6], %4 {strides = array<i32>} : memref<16x128xf32, #tpu.memory_space<vmem>>, vector<16x128xf32>,
    %6 = arith.mulf %0, %1 : vector<16x128xf32>
    %c0_7 = arith.constant 0 : index
    %c0_8 = arith.constant 0 : index
    %7 = vector.load %arg5[%c0_7, %c0_8] : memref<16x128xf32, #tpu.memory_space<vmem>>, vector<16x128xf32>
    tpu.vector_store %arg5[%c0_7, %c0_8], %6 {strides = array<i32>} : memref<16x128xf32, #tpu.memory_space<vmem>>, vector<16x128xf32>,
    %cst = arith.constant 9.99999993E-9 : f32
    %8 = vector.broadcast %cst : f32 to vector<16x128xf32>
    %9 = arith.addf %1, %8 : vector<16x128xf32>
    %10 = arith.divf %0, %9 : vector<16x128xf32>
    %c0_9 = arith.constant 0 : index
    %c0_10 = arith.constant 0 : index
    %11 = vector.load %arg6[%c0_9, %c0_10] : memref<16x128xf32, #tpu.memory_space<vmem>>, vector<16x128xf32>
    tpu.vector_store %arg6[%c0_9, %c0_10], %10 {strides = array<i32>} : memref<16x128xf32, #tpu.memory_space<vmem>>, vector<16x128xf32>,
    %12 = arith.cmpf ogt, %0, %1 : vector<16x128xf32>
    %13 = arith.extui %12 : vector<16x128xi1> to vector<16x128xi8>
    %c0_11 = arith.constant 0 : index
    %c0_12 = arith.constant 0 : index
    %14 = vector.load %arg7[%c0_11, %c0_12] : memref<16x128xi8, #tpu.memory_space<vmem>>, vector<16x128xi8>
    tpu.vector_store %arg7[%c0_11, %c0_12], %13 {strides = array<i32>} : memref<16x128xi8, #tpu.memory_space<vmem>>, vector<16x128xi8>,
    return
  }
  func.func @transform_0(%arg0: i32) -> (i32, i32) {
    %c0_i32 = arith.constant 0 : i32
    %c0_i32_0 = arith.constant 0 : i32
    return %arg0, %c0_i32 : i32, i32
  }
  func.func @transform_1(%arg0: i32) -> (i32, i32) {
    %c0_i32 = arith.constant 0 : i32
    %c0_i32_0 = arith.constant 0 : i32
    return %arg0, %c0_i32 : i32, i32
  }
  func.func @transform_2(%arg0: i32) -> (i32, i32) {
    %c0_i32 = arith.constant 0 : i32
    %c0_i32_0 = arith.constant 0 : i32
    return %arg0, %c0_i32 : i32, i32
  }
  func.func @transform_3(%arg0: i32) -> (i32, i32) {
    %c0_i32 = arith.constant 0 : i32
    %c0_i32_0 = arith.constant 0 : i32
    return %arg0, %c0_i32 : i32, i32
  }
  func.func @transform_4(%arg0: i32) -> (i32, i32) {
    %c0_i32 = arith.constant 0 : i32
    %c0_i32_0 = arith.constant 0 : i32
    return %arg0, %c0_i32 : i32, i32
  }
  func.func @transform_5(%arg0: i32) -> (i32, i32) {
    %c0_i32 = arith.constant 0 : i32
    %c0_i32_0 = arith.constant 0 : i32
    return %arg0, %c0_i32 : i32, i32
  }
  func.func @transform_6(%arg0: i32) -> (i32, i32) {
    %c0_i32 = arith.constant 0 : i32
    %c0_i32_0 = arith.constant 0 : i32
    return %arg0, %c0_i32 : i32, i32
  }
}

</mosaic_0001>

<bundles_post_ra>
// kernel: tpu_custom_call.1
= control target key start
LH: loop header
LB: loop body
LE: loop exit
PB: predicated region body
PF: predicated region fallthrough
CT: control target
= control target key end

     0   :  { %6 = vsyncpa [#allocation3], 0  ;;  %s59_s9 = smov [#allocation2]   ;;  %s77_s0 = inlined_call_operand.hbm [shape: f32[8,128], index: 0, kind: input, shape index: {}]   ;;  %s78_s1 = inlined_call_operand.vmem [shape: s32[8,128], index: 1, kind: output, shape index: {}]  }
   0x1   :  { %s12_s8 = sshll.u32 %s77_s0, 4  ;;  %s14_s10 = sshll.u32 %s59_s9, 4  ;;  %s13_s8 = int_to_ptr.hbm [resolvable:$true] %s12_s8  ;;  %s15_s10 = int_to_ptr.vmem [resolvable:$true] %s14_s10 }
   0x2   :  { %17 = dma.hbm_to_vmem [thread:$0]  %s13_s8, 128, %s15_s10, [#allocation3]  }
   0x3   :  { %57 = dma.done.wait [#allocation3], 128  }
   0x4   :  { %58 = vsyncadd [#allocation3], 4294967168  ;;  %v22_v0 = vld [vmem:[#allocation2] sm:$0xff]  ;;  %v60_v1 = vmov 0  }
   0x5   :  { %vm23_vm0 = vcmp.gt.f32.partialorder %v22_v0, 0.0 }
   0x6   :  { %v24_v2 = vsel %vm23_vm0, 1, %v60_v1 }
   0x7   :  { %25 = vst [vmem:[%s78_s1] sm:$0xff] %v24_v2 }
   0x8   :  { %30 = vsyncpa [#allocation3], 1 }

// kernel: tpu_custom_call.1
= control target key start
LH: loop header
LB: loop body
LE: loop exit
PB: predicated region body
PF: predicated region fallthrough
CT: control target
= control target key end

     0   :  { %12 = vsyncpa [#allocation3], 0  ;;  %s528_s0 = inlined_call_operand.hbm [shape: f32[16,128], index: 0, kind: input, shape index: {}]   ;;  %s529_s1 = inlined_call_operand.hbm [shape: f32[16,128], index: 1, kind: input, shape index: {}]   ;;  %s530_s2 = inlined_call_operand.hbm [shape: f32[16,128], index: 2, kind: output, shape index: {0}]   ;;  %s531_s3 = inlined_call_operand.hbm [shape: f32[16,128], index: 3, kind: output, shape index: {1}]   ;;  %s532_s4 = inlined_call_operand.hbm [shape: f32[16,128], index: 4, kind: output, shape index: {2}]   ;;  %s533_s5 = inlined_call_operand.hbm [shape: f32[16,128], index: 5, kind: output, shape index: {3}]   ;;  %s534_s6 = inlined_call_operand.hbm [shape: s8[16,128], index: 6, kind: output, shape index: {4}]  }
   0x1   :  { %13 = vsyncpa [#allocation6], 0 }
   0x2   :  { %14 = vsyncpa [#allocation4], 0 }
   0x3   :  { %15 = vsyncpa [#allocation9], 0 }
   0x4   :  { %16 = vsyncpa [#allocation12], 0  ;;  %s21_s23 = sshll.u32 %s528_s0, 4  ;;  %s403_s24 = smov [#allocation2]   ;;  %s22_s23 = int_to_ptr.hbm [resolvable:$true] %s21_s23 }
   0x5   :  { %s23_s25 = sshll.u32 %s403_s24, 4  ;;  %s34_s28 = sshll.u32 %s529_s1, 4  ;;  %s24_s25 = int_to_ptr.vmem [resolvable:$true] %s23_s25  ;;  %s35_s28 = int_to_ptr.hbm [resolvable:$true] %s34_s28 }
   0x6   :  { %s404_s29 = smov 128   ;;  %s405_s30 = smov 8  }
   0x7   :  { %29 = dma.hbm_to_vmem [thread:$0]  %s22_s23, 256, %s24_s25, [#allocation3], %s404_s29, %s404_s29, %s405_s30  }
   0x8   :  { %s406_s7 = smov [#allocation5]  }
   0x9   :  { %s36_s8 = sshll.u32 %s406_s7, 4  ;;  %s37_s8 = int_to_ptr.vmem [resolvable:$true] %s36_s8 }
   0xa   :  { %42 = dma.hbm_to_vmem [thread:$0]  %s35_s28, 256, %s37_s8, [#allocation6], %s404_s29, %s404_s29, %s405_s30  }
   0xb   :  { %393 = dma.done.wait [#allocation3], 256  }
   0xc   :  { %394 = vsyncadd [#allocation3], 4294967040 }
   0xd   :  { %395 = dma.done.wait [#allocation6], 256  }
   0xe   :  { %396 = vsyncadd [#allocation6], 4294967040  ;;  %s407_s0 = smov [#allocation8]   ;;  %s138_s11 = sshll.u32 %s531_s3, 4  ;;  %v467_v0 = vld [vmem:[#allocation2] sm:$0xff]  ;;  %v55_v1 = vld [vmem:[#allocation5] sm:$0xff]  ;;  %s139_s11 = int_to_ptr.hbm [resolvable:$true] %s138_s11 }
   0xf   :  { %s462_s1 = sshll.u32 %s407_s0, 4  ;;  %v61_v2 = vsub.f32 %v467_v0, %v55_v1  ;;  %v69_v3 = vadd.f32 1e-08, %v55_v1  ;;  %v470_v4 = vld [vmem:[#allocation2 + $0x8] sm:$0xff]  ;;  %v56_v5 = vld [vmem:[#allocation5 + $0x8] sm:$0xff]  ;;  %v57_v6 = vadd.f32 %v55_v1, %v467_v0  ;;  %s408_s12 = smov [#allocation7]   ;;  %v65_v10 = vmul.f32 %v55_v1, %v467_v0  ;;  %s137_s1 = int_to_ptr.vmem [resolvable:$true] %s462_s1 }
  0x10   :  { %s473_s13 = sshll.u32 %s408_s12, 4  ;;  %s125_s16 = sshll.u32 %s530_s2, 4  ;;  %v62_v7 = vsub.f32 %v470_v4, %v56_v5  ;;  %v70_v8 = vadd.f32 1e-08, %v56_v5  ;;  %v58_v9 = vadd.f32 %v56_v5, %v470_v4  ;;  %v66_v11 = vmul.f32 %v56_v5, %v470_v4  ;;  %s124_s13 = int_to_ptr.vmem [resolvable:$true] %s473_s13  ;;  %s126_s16 = int_to_ptr.hbm [resolvable:$true] %s125_s16 }
  0x11   :  { %63 = vst [vmem:[#allocation8] sm:$0xff] %v61_v2  ;;  %221 = vrcp.f32 %v69_v3  ;;  %s409_s3 = smov [#allocation10]   ;;  %s151_s20 = sshll.u32 %s532_s4, 4  ;;  %vm103_vm0 = vcmp.gt.f32.partialorder %v467_v0, %v55_v1  ;;  %vm104_vm1 = vcmp.gt.f32.partialorder %v470_v4, %v56_v5  ;;  %v410_v12 = vmov 0   ;;  %s152_s20 = int_to_ptr.hbm [resolvable:$true] %s151_s20 }
  0x12   :  { %s149_s17 = sshll.u32 %s409_s3, 4  ;;  %64 = vst [vmem:[#allocation8 + $0x8] sm:$0xff] %v62_v7  ;;  %223 = vrcp.f32 %v70_v8  ;;  %vm105_vm2 = vmpackc.low %vm104_vm1, %vm103_vm0  ;;  %vm76_vm3 = vweird.f32 %v69_v3  ;;  %v80_v18 = vand.u32 2147483647, %v69_v3  ;;  %v82_v19 = vand.u32 2147483648, %v69_v3  ;;  %s411_s2 = smov [#allocation11]   ;;  %s150_s17 = int_to_ptr.vmem [resolvable:$true] %s149_s17 }
  0x13   :  { %59 = vst [vmem:[#allocation7] sm:$0xff] %v57_v6  ;;  %144 = dma.vmem_to_hbm [thread:$0]  %s137_s1, 256, %s139_s11, [#allocation9], %s404_s29, %s404_s29, %s405_s30   ;;  %v106_v13 = vsel %vm105_vm2, 16711935, %v410_v12  ;;  %v97_v21 = vand.u32 2147483648, %v70_v8  ;;  %vm91_vm6 = vweird.f32 %v70_v8 }
  0x14   :  { %60 = vst [vmem:[#allocation7 + $0x8] sm:$0xff] %v58_v9  ;;  %v108_v14 = vpack.c.b8 %v106_v13, %v106_v13  ;;  %v95_v27 = vand.u32 2147483647, %v70_v8  ;;  %vm503_vm9 = vcmp.eq.f32.partialorder %v80_v18, 8.507059e+37  ;;  %v83_v33 = vor.u32 1.1754944e-38, %v82_v19  ;;  %s162_s4 = sshll.u32 %s411_s2, 4  ;;  %s163_s4 = int_to_ptr.vmem [resolvable:$true] %s162_s4 }
  0x15   :  { %67 = vst [vmem:[#allocation10] sm:$0xff] %v65_v10  ;;  %131 = dma.vmem_to_hbm [thread:$0]  %s124_s13, 256, %s126_s16, [#allocation4], %s404_s29, %s404_s29, %s405_s30   ;;  %v98_v37 = vor.u32 1.1754944e-38, %v97_v21 }
  0x16   :  { %68 = vst [vmem:[#allocation10 + $0x8] sm:$0xff] %v66_v11  ;;  %vm109_vm4 = vnez %v108_v14  ;;  %vm96_vm11 = vcmp.eq.f32.partialorder %v95_v27, 8.507059e+37  ;;  %s164_s23 = sshll.u32 %s533_s5, 4  ;;  %s412_s24 = smov [#allocation13]   ;;  %s165_s23 = int_to_ptr.hbm [resolvable:$true] %s164_s23 }
  0x17   :  { %v222_v15 = vpop.eup %221  ;;  %157 = dma.vmem_to_hbm [thread:$0]  %s150_s17, 256, %s152_s20, [#allocation9], %s404_s29, %s404_s29, %s405_s30   ;;  %v110_v22 = vsel %vm109_vm4, 16843009, %v410_v12 }
  0x18   :  { %v224_v16 = vpop.eup %223  ;;  %v72_v17 = vmul.f32 %v222_v15, %v69_v3  ;;  %vm77_vm5 = vweird.f32 %v222_v15  ;;  %v111_v24 = vunpack.c.0.s8 %v110_v22  ;;  %v112_v25 = vunpack.c.1.s8 %v110_v22  ;;  %s175_s25 = sshll.u32 %s412_s24, 4  ;;  %s177_s28 = sshll.u32 %s534_s6, 4  ;;  %s176_s25 = int_to_ptr.vmem [resolvable:$true] %s175_s25  ;;  %s178_s28 = int_to_ptr.hbm [resolvable:$true] %s177_s28 }
  0x19   :  { %v87_v20 = vmul.f32 %v224_v16, %v70_v8  ;;  %vm92_vm7 = vweird.f32 %v224_v16  ;;  %vm499_vm8 = vmor %vm76_vm3, %vm77_vm5  ;;  %s413_s5 = smov 32   ;;  %s414_s6 = smov 2  }
  0x1a   :  { %v73_v23 = vsub.f32 1.0, %v72_v17  ;;  %v113_v29 = vpack.c.b16 %v111_v24, %v111_v24  ;;  %v115_v30 = vpack.c.b16 %v112_v25, %v112_v25  ;;  %vm507_vm10 = vmor %vm91_vm6, %vm92_vm7 }
  0x1b   :  { %v88_v26 = vsub.f32 1.0, %v87_v20 }
  0x1c   :  { %v74_v28 = vmul.f32 %v222_v15, %v73_v23  ;;  %v114_v38 = vpack.c.b8 %v113_v29, %v113_v29  ;;  %v116_v39 = vpack.c.b8 %v115_v30, %v115_v30 }
  0x1d   :  { %v89_v34 = vmul.f32 %v224_v16, %v88_v26 }
  0x1e   :  { %v75_v35 = vadd.f32 %v222_v15, %v74_v28  ;;  %117 = vst [vmem:[#allocation13] sm:$0x3] %v114_v38 }
  0x1f   :  { %v90_v40 = vadd.f32 %v224_v16, %v89_v34  ;;  %118 = vst [vmem:[#allocation13 + $0x2] sm:$0x3] %v116_v39 }
  0x20   :  { %v79_v41 = vsel %vm499_vm8, %v222_v15, %v75_v35 }
  0x21   :  { %v84_v42 = vsel %vm503_vm9, %v83_v33, %v79_v41  ;;  %v94_v43 = vsel %vm507_vm10, %v224_v16, %v90_v40 }
  0x22   :  { %v85_v44 = vmul.f32 %v84_v42, %v467_v0  ;;  %v99_v45 = vsel %vm96_vm11, %v98_v37, %v94_v43 }
  0x23   :  { %v100_v46 = vmul.f32 %v99_v45, %v470_v4 }
  0x24   :  { %101 = vst [vmem:[#allocation11] sm:$0xff] %v85_v44 }
  0x25   :  { %102 = vst [vmem:[#allocation11 + $0x8] sm:$0xff] %v100_v46 }
  0x26   :  { %170 = dma.vmem_to_hbm [thread:$0]  %s163_s4, 256, %s165_s23, [#allocation12], %s404_s29, %s404_s29, %s405_s30  }
  0x27   :  { %183 = dma.vmem_to_hbm [thread:$0]  %s176_s25, 64, %s178_s28, [#allocation12], %s413_s5, %s413_s5, %s414_s6  }
  0x28   :  { %397 = dma.done.wait [#allocation4], 256  }
  0x29   :  { %398 = vsyncadd [#allocation4], 4294967040 }
  0x2a   :  { %399 = dma.done.wait [#allocation9], 512  }
  0x2b   :  { %400 = vsyncadd [#allocation9], 4294966784 }
  0x2c   :  { %401 = dma.done.wait [#allocation12], 320  }
  0x2d   :  { %402 = vsyncadd [#allocation12], 4294966976 }
  0x2e   :  { %204 = vsyncpa [#allocation3], 1 }
  0x2f   :  { %205 = vsyncpa [#allocation6], 1 }
  0x30   :  { %206 = vsyncpa [#allocation4], 1 }
  0x31   :  { %207 = vsyncpa [#allocation9], 1 }
  0x32   :  { %208 = vsyncpa [#allocation12], 1 }

</bundles_post_ra>
